<compile_context>
chip_gen: v5e
topology: v5e:2x2
jax: 0.10.0
libtpu: 0.0.40
codegen_flags: <defaults>
</compile_context>

<pallas_src>
import functools

import jax
import jax.numpy as jnp
from jax.experimental import pallas as pl
from jax.experimental.pallas import tpu as pltpu


# ------------------------------- kernels ----------------------------------


def _rowmean_kernel(x_ref, o_ref, *, inv_hw):
    """Common case: x_ref = (Rt, HW) full-row block, o_ref = (Rt, 1).

    Each grid step owns a disjoint output slice -> no accumulator, no pl.when,
    single 'parallel' grid axis.  Sum accumulates in f32 via the dtype arg (no
    materialized full-tile f32 cast for bf16/fp8 inputs).
    """
    s = jnp.sum(x_ref[...], axis=-1, keepdims=True, dtype=jnp.float32)
    o_ref[...] = (s * inv_hw).astype(o_ref.dtype)


def _rowmean_chunked_kernel(x_ref, o_ref, acc_ref, *, inv_hw, hw_total, hw_chunk):
    """Fallback for huge H*W: x_ref = (Rt, hw_chunk), reduction axis k is last.

    acc_ref (Rt, 1) f32 accumulates across k; masked lanes handle a ragged
    last chunk; divide by the TRUE full H*W at finalize.  Note: accumulation
    is only across H*W within a row block, never across rows, so garbage in a
    partial last row block is discarded by the masked output write.
    """
    k = pl.program_id(1)

    @pl.when(k == 0)
    def _init():
        acc_ref[...] = jnp.zeros_like(acc_ref)

    x = x_ref[...]
    if hw_total % hw_chunk != 0:
        # Ragged last chunk: zero out lanes beyond the true H*W extent.
        col = jax.lax.broadcasted_iota(jnp.int32, x.shape, 1) + k * hw_chunk
        x = jnp.where(col < hw_total, x, jnp.zeros_like(x))
    acc_ref[...] += jnp.sum(x, axis=-1, keepdims=True, dtype=jnp.float32)

    @pl.when(k == pl.num_programs(1) - 1)
    def _finalize():
        o_ref[...] = (acc_ref[...] * inv_hw).astype(o_ref.dtype)


# ------------------------------ tiling logic -------------------------------


def _usable_vmem_bytes():
    """Physical VMEM per core minus ~25% headroom; conservative 64 MiB fallback."""
    cap = 64 << 20  # v7x per-TC VMEM (smallest of the three generations)
    try:
        info = pltpu.get_tpu_info()
        cap = int(getattr(info, "vmem_capacity_bytes", cap)) or cap
    except Exception:
        pass
    return max(32 << 20, (cap * 3) // 4)


# Below this many input bytes, XLA's fused reduce beats kernel launch +
# per-grid-step overhead; skip Pallas unless explicitly forced.
_PALLAS_MIN_BYTES = 1 << 20


def avg_pool(feat, *, tile_budget_bytes=None, force_pallas=False, target_steps=8):
    """feat: [B, C, H, W] -> [B, C], mean over the last two dims."""
    B, C, H, W = feat.shape
    HW = H * W
    N = B * C
    itemsize = jnp.dtype(feat.dtype).itemsize

    if not force_pallas and feat.size * itemsize < _PALLAS_MIN_BYTES:
        # Toy-sized inputs: XLA's fused mean wins on launch overhead.
        return feat.mean(axis=(-2, -1))

    usable_vmem = _usable_vmem_bytes()
    # Budget leaves room for: 2x double-buffered input tiles (+ a possible f32
    # reduce temporary for sub-32-bit inputs) + output + slack, under the cap.
    budget_div = 3 if itemsize >= 4 else 5
    default_budget = usable_vmem // budget_div
    if tile_budget_bytes is None:
        tile_budget_bytes = default_budget
    tile_budget_bytes = min(tile_budget_bytes, default_budget)

    # Lane-dense, contiguity-preserving layout: rows = (b, c), lanes = H*W.
    x = feat.reshape(N, HW)

    row_bytes = HW * itemsize
    min_rows = min(8, N)

    if min_rows * row_bytes <= tile_budget_bytes:
        # Common case: full H*W per block (one contiguous DMA per step).
        hw_chunk = HW
        max_rows = tile_budget_bytes // row_bytes
        rt = min(max_rows, N, max(min_rows, pl.cdiv(N, target_steps)))
        if rt < N and N >= 8:
            rt = (rt // 8) * 8        # (8,128) sublane constraint
        else:
            rt = min(rt, N)           # block equals full row extent
    else:
        # Huge H*W: chunk the reduction axis (multiple of 128 + lane mask).
        rt = min_rows
        hw_chunk = max(128, (tile_budget_bytes // (rt * itemsize)) // 128 * 128)
        if hw_chunk >= HW:
            hw_chunk = HW

    nb = pl.cdiv(N, rt)
    nk = pl.cdiv(HW, hw_chunk)
    inv_hw = 1.0 / float(HW)

    if nk == 1:
        kernel = functools.partial(_rowmean_kernel, inv_hw=inv_hw)
        grid = (nb,)
        in_specs = [pl.BlockSpec((rt, hw_chunk), lambda i: (i, 0))]
        out_specs = pl.BlockSpec((rt, 1), lambda i: (i, 0))
        scratch_shapes = []
        dim_sem = ("parallel",)
        acc_bytes = 0
    else:
        kernel = functools.partial(
            _rowmean_chunked_kernel, inv_hw=inv_hw, hw_total=HW, hw_chunk=hw_chunk
        )
        grid = (nb, nk)  # reduction axis last
        in_specs = [pl.BlockSpec((rt, hw_chunk), lambda i, k: (i, k))]
        out_specs = pl.BlockSpec((rt, 1), lambda i, k: (i, 0))
        scratch_shapes = [pltpu.VMEM((rt, 1), jnp.float32)]
        dim_sem = ("parallel", "arbitrary")
        acc_bytes = rt * 4

    # VMEM accounting: double-buffered input + possible f32 reduce temp
    # (sub-32-bit inputs) + double-buffered output + accumulator + slack.
    in_tile = rt * hw_chunk * itemsize
    f32_temp = rt * hw_chunk * 4 if itemsize < 4 else 0
    out_tile = rt * max(itemsize, 4)
    need = 2 * in_tile + f32_temp + 2 * out_tile + acc_bytes
    vmem_limit = int(min(usable_vmem, max(need + (4 << 20), 32 << 20)))

    out = pl.pallas_call(
        kernel,
        out_shape=jax.ShapeDtypeStruct((N, 1), feat.dtype),
        grid_spec=pltpu.PrefetchScalarGridSpec(
            num_scalar_prefetch=0,
            grid=grid,
            in_specs=in_specs,
            out_specs=out_specs,
            scratch_shapes=scratch_shapes,
        ),
        compiler_params=pltpu.CompilerParams(
            dimension_semantics=dim_sem,
            vmem_limit_bytes=vmem_limit,
        ),
    )(x)
    return out.reshape(B, C)


if __name__ == "__main__":
    root = jax.random.PRNGKey(0)
    k1, k2, k3, k4 = jax.random.split(root, 4)

    # 1) Module-spec small shape, forced through the Pallas path (simple kernel).
    B, C, H, W = 2, 4, 16, 16
    feat = jax.random.normal(k1, (B, C, H, W), dtype=jnp.float32)
    out = avg_pool(feat, force_pallas=True)
    jax.block_until_ready(out)
    ref = feat.mean(axis=(-2, -1))
    assert out.shape == (B, C)
    assert jnp.allclose(out, ref, atol=1e-5, rtol=1e-5)

    # 2) Tiny tile budget -> H*W chunking fallback with the f32 accumulator,
    #    multiple row blocks and a partial last row block.
    B2, C2, H2, W2 = 10, 8, 16, 16
    feat2 = jax.random.normal(k2, (B2, C2, H2, W2), dtype=jnp.float32)
    out2 = avg_pool(feat2, force_pallas=True, tile_budget_bytes=4096)
    jax.block_until_ready(out2)
    ref2 = feat2.mean(axis=(-2, -1))
    assert out2.shape == (B2, C2)
    assert jnp.allclose(out2, ref2, atol=1e-5, rtol=1e-5)

    # 3) Bigger shape through the default auto-tiled path: full-H*W contiguous
    #    row blocks, ~8 parallel grid steps, no accumulator.
    B3, C3, H3, W3 = 16, 64, 32, 32
    feat3 = jax.random.normal(k3, (B3, C3, H3, W3), dtype=jnp.float32)
    out3 = avg_pool(feat3)
    jax.block_until_ready(out3)
    ref3 = feat3.mean(axis=(-2, -1))
    assert out3.shape == (B3, C3)
    assert jnp.allclose(out3, ref3, atol=1e-5, rtol=1e-5)

    # 4) Non-multiple-of-128 H*W with a tiny budget -> ragged last chunk,
    #    exercises the in-kernel lane mask.
    B4, C4, H4, W4 = 4, 8, 17, 17
    feat4 = jax.random.normal(k4, (B4, C4, H4, W4), dtype=jnp.float32)
    out4 = avg_pool(feat4, force_pallas=True, tile_budget_bytes=4096)
    jax.block_until_ready(out4)
    ref4 = feat4.mean(axis=(-2, -1))
    assert out4.shape == (B4, C4)
    assert jnp.allclose(out4, ref4, atol=1e-5, rtol=1e-5)

    print("KERNEL_OK")
</pallas_src>

<mosaic_0001>
module attributes {stable_mosaic.version = 11 : i64} {
  func.func @_rowmean_kernel(%arg0: i32, %arg1: memref<8x256xf32, #tpu.memory_space<vmem>>, %arg2: memref<8x1xf32, #tpu.memory_space<vmem>>) attributes {dimension_semantics = [#tpu.dimension_semantics<parallel>], iteration_bounds = array<i64: 1>, scalar_prefetch = 0 : i64, scratch_operands = 0 : i64, tpu.core_type = #tpu.core_type<tc>, window_params = [{transform_indices = @transform_0, window_bounds = array<i64: 8, 256>}, {transform_indices = @transform_1, window_bounds = array<i64: 8, 1>}]} {
    %c0 = arith.constant 0 : index
    %c0_0 = arith.constant 0 : index
    %0 = vector.load %arg1[%c0, %c0_0] : memref<8x256xf32, #tpu.memory_space<vmem>>, vector<8x256xf32>
    %cst = arith.constant dense<0.000000e+00> : vector<8xf32>
    %1 = vector.multi_reduction <add>, %0, %cst [1] : vector<8x256xf32> to vector<8xf32>
    %2 = vector.shape_cast %1 : vector<8xf32> to vector<8x1xf32>
    %cst_1 = arith.constant 3.906250e-03 : f32
    %3 = vector.broadcast %cst_1 : f32 to vector<8x1xf32>
    %4 = arith.mulf %2, %3 : vector<8x1xf32>
    %c0_2 = arith.constant 0 : index
    %c0_3 = arith.constant 0 : index
    %5 = vector.load %arg2[%c0_2, %c0_3] : memref<8x1xf32, #tpu.memory_space<vmem>>, vector<8x1xf32>
    tpu.vector_store %arg2[%c0_2, %c0_3], %4 {strides = array<i32>} : memref<8x1xf32, #tpu.memory_space<vmem>>, vector<8x1xf32>,
    return
  }
  func.func @transform_0(%arg0: i32) -> (i32, i32) {
    %c0_i32 = arith.constant 0 : i32
    %c0_i32_0 = arith.constant 0 : i32
    return %arg0, %c0_i32 : i32, i32
  }
  func.func @transform_1(%arg0: i32) -> (i32, i32) {
    %c0_i32 = arith.constant 0 : i32
    %c0_i32_0 = arith.constant 0 : i32
    return %arg0, %c0_i32 : i32, i32
  }
}

</mosaic_0001>

<bundles_post_ra>
// kernel: tpu_custom_call.1
= control target key start
LH: loop header
LB: loop body
LE: loop exit
PB: predicated region body
PF: predicated region fallthrough
CT: control target
= control target key end

     0   :  { %6 = vsyncpa [#allocation3], 0  ;;  %s62_s9 = smov [#allocation2]   ;;  %s79_s0 = inlined_call_operand.hbm [shape: f32[8,256], index: 0, kind: input, shape index: {}]   ;;  %s80_s1 = inlined_call_operand.vmem [shape: f32[8,1], index: 1, kind: output, shape index: {}]  }
   0x1   :  { %s12_s8 = sshll.u32 %s79_s0, 4  ;;  %s14_s10 = sshll.u32 %s62_s9, 4  ;;  %s13_s8 = int_to_ptr.hbm [resolvable:$true] %s12_s8  ;;  %s15_s10 = int_to_ptr.vmem [resolvable:$true] %s14_s10 }
   0x2   :  { %17 = dma.hbm_to_vmem [thread:$0]  %s13_s8, 256, %s15_s10, [#allocation3]  }
   0x3   :  { %60 = dma.done.wait [#allocation3], 256  }
   0x4   :  { %61 = vsyncadd [#allocation3], 4294967040  ;;  %v22_v0 = vld [vmem:[#allocation2] sm:$0xff]  ;;  %v23_v1 = vld [vmem:[#allocation2 + $0x8] sm:$0xff]  ;;  %vm28_vm0 = vcmask 7168  }
   0x5   :  { %v24_v2 = vadd.f32 %v23_v1, %v22_v0 }
   0x7   :  { %25 = vadd.xlane.f32.xlu0 %v24_v2 }
  0x7a   :  { %v26_v3 = vpop.xlane.xlu0 %25 }
  0x7b   :  { %v27_v4 = vmul.f32 0.00390625, %v26_v3 }
  0x7d   :  { %29 = vst.msk [vmem:[%s80_s1] sm:$0xff] %vm28_vm0, %v27_v4 }
  0x7e   :  { %34 = vsyncpa [#allocation3], 1 }

</bundles_post_ra>
